<compile_context>
chip_gen: v5e
topology: v5e:2x2
jax: 0.10.0
libtpu: 0.0.40
codegen_flags: <defaults>
</compile_context>

<pallas_src>
import functools

import jax
import jax.numpy as jnp
from jax.experimental import pallas as pl
from jax.experimental.pallas import tpu as pltpu

LANES = 128    # padded feature width for every layer (lane-dense everywhere)
TILE_M = 128   # row-block size; working set per step << VMEM on v5e/v6e/v7x


def _round_up(n, m):
    return ((n + m - 1) // m) * m


def mlp_kernel(x_ref, w_ref, b_ref, o_ref, *, k1p):
    """One (TILE_M, 128) row block of the 4-layer MLP, entirely in VMEM."""
    f32 = jnp.float32
    # Static, 128-aligned row slices into the packed weight slab.
    w1 = w_ref[0:k1p, :]
    w2 = w_ref[k1p:k1p + LANES, :]
    w3 = w_ref[k1p + LANES:k1p + 2 * LANES, :]
    w4 = w_ref[k1p + 2 * LANES:k1p + 3 * LANES, :]

    h = jnp.dot(x_ref[...], w1, preferred_element_type=f32) + b_ref[0:1, :]
    h = jnp.maximum(h, 0.0)
    h = jnp.dot(h.astype(jnp.bfloat16), w2, preferred_element_type=f32) + b_ref[1:2, :]
    h = jnp.maximum(h, 0.0)
    h = jnp.dot(h.astype(jnp.bfloat16), w3, preferred_element_type=f32) + b_ref[2:3, :]
    h = jnp.maximum(h, 0.0)
    h = jnp.dot(h.astype(jnp.bfloat16), w4, preferred_element_type=f32) + b_ref[3:4, :]
    # Padded lanes hold tanh(0) = 0; the wrapper slices the real 2 output columns.
    o_ref[...] = jnp.tanh(h)


def init_params(key, input_size):
    """PyTorch nn.Linear-style init; weights stored as (in, out) so y = x @ W + b."""
    dims = [(input_size, 32), (32, 64), (64, 32), (32, 2)]
    params = []
    for fan_in, fan_out in dims:
        key, kw, kb = jax.random.split(key, 3)
        bound = 1.0 / jnp.sqrt(float(fan_in))
        w = jax.random.uniform(kw, (fan_in, fan_out), jnp.float32, -bound, bound)
        b = jax.random.uniform(kb, (fan_out,), jnp.float32, -bound, bound)
        params.append((w, b))
    return params


def pack_params(params, input_size):
    """Pack all weights into one zero-padded bf16 slab and all biases into one f32 slab."""
    k1p = _round_up(input_size, LANES)                 # padded contraction dim of layer 1
    row_pads = [k1p, LANES, LANES, LANES]
    w_slab = jnp.zeros((k1p + 3 * LANES, LANES), jnp.bfloat16)
    b_slab = jnp.zeros((8, LANES), jnp.float32)        # rows 0..3 used, padded to 8 sublanes
    off = 0
    for i, ((w, b), rows) in enumerate(zip(params, row_pads)):
        din, dout = w.shape
        w_slab = w_slab.at[off:off + din, :dout].set(w.astype(jnp.bfloat16))
        b_slab = b_slab.at[i, :dout].set(b)
        off += rows
    return w_slab, b_slab, k1p


def mlp_forward(x, w_slab, b_slab, *, k1p, tile_m=TILE_M):
    # Same reshape semantics as the PyTorch forward: x.view(-1, x.shape[0]*x.shape[1]).
    feat = x.shape[0] * x.shape[1]
    flat = x.reshape(-1, feat)
    n_rows = flat.shape[0]

    m_pad = _round_up(n_rows, tile_m)
    xp = jnp.pad(flat.astype(jnp.bfloat16),
                 ((0, m_pad - n_rows), (0, k1p - feat)))

    # TODO(synk): if this MLP is invoked repeatedly per training/inference step, fold
    # that repetition into an extra grid axis so the weight slab also stays resident
    # across steps instead of being re-fetched every pallas_call.
    out = pl.pallas_call(
        functools.partial(mlp_kernel, k1p=k1p),
        out_shape=jax.ShapeDtypeStruct((m_pad, LANES), jnp.float32),
        grid=(m_pad // tile_m,),
        in_specs=[
            pl.BlockSpec((tile_m, k1p), lambda i: (i, 0)),   # activation row block
            pl.BlockSpec(w_slab.shape, lambda i: (0, 0)),    # weights: VMEM-resident
            pl.BlockSpec(b_slab.shape, lambda i: (0, 0)),    # biases:  VMEM-resident
        ],
        out_specs=pl.BlockSpec((tile_m, LANES), lambda i: (i, 0)),
        compiler_params=pltpu.CompilerParams(
            dimension_semantics=("parallel",)),              # shard row blocks (v7x 2 TCs)
    )(xp, w_slab, b_slab)

    return out[:n_rows, :2]


if __name__ == "__main__":
    key = jax.random.PRNGKey(0)
    kx, kp = jax.random.split(key)

    # x.shape[0]*x.shape[1] = 32 = input_size; trailing dim gives 256 batched rows
    # after the module's view(-1, 32), i.e. two 128-row grid steps.
    x = jax.random.normal(kx, (4, 8, 256), jnp.float32)
    input_size = x.shape[0] * x.shape[1]

    params = init_params(kp, input_size)
    w_slab, b_slab, k1p = pack_params(params, input_size)

    out = mlp_forward(x, w_slab, b_slab, k1p=k1p)
    out = jax.block_until_ready(out)

    # Pure-JAX reference mirroring the kernel numerics (bf16 operands, f32 accum).
    ref = x.reshape(-1, input_size)
    for i, (w, b) in enumerate(params):
        ref = jnp.dot(ref.astype(jnp.bfloat16), w.astype(jnp.bfloat16),
                      preferred_element_type=jnp.float32) + b
        ref = jnp.maximum(ref, 0.0) if i < 3 else jnp.tanh(ref)

    assert out.shape == (256, 2), out.shape
    assert jnp.allclose(out, ref, atol=1e-3), float(jnp.max(jnp.abs(out - ref)))

    print("KERNEL_OK")
</pallas_src>

<mosaic_0001>
module attributes {stable_mosaic.version = 11 : i64} {
  func.func @mlp_kernel(%arg0: i32, %arg1: memref<128x128xbf16, #tpu.memory_space<vmem>>, %arg2: memref<512x128xbf16, #tpu.memory_space<vmem>>, %arg3: memref<8x128xf32, #tpu.memory_space<vmem>>, %arg4: memref<128x128xf32, #tpu.memory_space<vmem>>) attributes {dimension_semantics = [#tpu.dimension_semantics<parallel>], iteration_bounds = array<i64: 2>, scalar_prefetch = 0 : i64, scratch_operands = 0 : i64, tpu.core_type = #tpu.core_type<tc>, window_params = [{transform_indices = @transform_0, window_bounds = array<i64: 128, 128>}, {pipeline_mode = #tpu.pipeline_mode<synchronous>, transform_indices = @transform_1, window_bounds = array<i64: 512, 128>}, {pipeline_mode = #tpu.pipeline_mode<synchronous>, transform_indices = @transform_2, window_bounds = array<i64: 8, 128>}, {transform_indices = @transform_3, window_bounds = array<i64: 128, 128>}]} {
    %c0 = arith.constant 0 : index
    %c0_0 = arith.constant 0 : index
    %0 = vector.load %arg2[%c0, %c0_0] : memref<512x128xbf16, #tpu.memory_space<vmem>>, vector<128x128xbf16>
    %c128 = arith.constant 128 : index
    %c0_1 = arith.constant 0 : index
    %1 = vector.load %arg2[%c128, %c0_1] : memref<512x128xbf16, #tpu.memory_space<vmem>>, vector<128x128xbf16>
    %c256 = arith.constant 256 : index
    %c0_2 = arith.constant 0 : index
    %2 = vector.load %arg2[%c256, %c0_2] : memref<512x128xbf16, #tpu.memory_space<vmem>>, vector<128x128xbf16>
    %c384 = arith.constant 384 : index
    %c0_3 = arith.constant 0 : index
    %3 = vector.load %arg2[%c384, %c0_3] : memref<512x128xbf16, #tpu.memory_space<vmem>>, vector<128x128xbf16>
    %c0_4 = arith.constant 0 : index
    %c0_5 = arith.constant 0 : index
    %4 = vector.load %arg1[%c0_4, %c0_5] : memref<128x128xbf16, #tpu.memory_space<vmem>>, vector<128x128xbf16>
    %cst = arith.constant dense<0.000000e+00> : vector<128x128xf32>
    %5 = tpu.matmul %4, %0, %cst {dimension_numbers = #tpu.dot_dimension_numbers<[1], [0], [0], [1], [0, 0, 1, 1], [], []>} : vector<128x128xbf16>, vector<128x128xbf16>, vector<128x128xf32> -> vector<128x128xf32>
    %c0_6 = arith.constant 0 : index
    %c0_7 = arith.constant 0 : index
    %6 = vector.load %arg3[%c0_6, %c0_7] : memref<8x128xf32, #tpu.memory_space<vmem>>, vector<1x128xf32>
    %7 = vector.broadcast %6 : vector<1x128xf32> to vector<128x128xf32>
    %8 = arith.addf %5, %7 : vector<128x128xf32>
    %cst_8 = arith.constant 0.000000e+00 : f32
    %9 = vector.broadcast %cst_8 : f32 to vector<128x128xf32>
    %10 = arith.maximumf %8, %9 : vector<128x128xf32>
    %11 = arith.truncf %10 : vector<128x128xf32> to vector<128x128xbf16>
    %cst_9 = arith.constant dense<0.000000e+00> : vector<128x128xf32>
    %12 = tpu.matmul %11, %1, %cst_9 {dimension_numbers = #tpu.dot_dimension_numbers<[1], [0], [0], [1], [0, 0, 1, 1], [], []>} : vector<128x128xbf16>, vector<128x128xbf16>, vector<128x128xf32> -> vector<128x128xf32>
    %c1 = arith.constant 1 : index
    %c0_10 = arith.constant 0 : index
    %13 = vector.load %arg3[%c1, %c0_10] : memref<8x128xf32, #tpu.memory_space<vmem>>, vector<1x128xf32>
    %14 = vector.broadcast %13 : vector<1x128xf32> to vector<128x128xf32>
    %15 = arith.addf %12, %14 : vector<128x128xf32>
    %cst_11 = arith.constant 0.000000e+00 : f32
    %16 = vector.broadcast %cst_11 : f32 to vector<128x128xf32>
    %17 = arith.maximumf %15, %16 : vector<128x128xf32>
    %18 = arith.truncf %17 : vector<128x128xf32> to vector<128x128xbf16>
    %cst_12 = arith.constant dense<0.000000e+00> : vector<128x128xf32>
    %19 = tpu.matmul %18, %2, %cst_12 {dimension_numbers = #tpu.dot_dimension_numbers<[1], [0], [0], [1], [0, 0, 1, 1], [], []>} : vector<128x128xbf16>, vector<128x128xbf16>, vector<128x128xf32> -> vector<128x128xf32>
    %c2 = arith.constant 2 : index
    %c0_13 = arith.constant 0 : index
    %20 = vector.load %arg3[%c2, %c0_13] : memref<8x128xf32, #tpu.memory_space<vmem>>, vector<1x128xf32>
    %21 = vector.broadcast %20 : vector<1x128xf32> to vector<128x128xf32>
    %22 = arith.addf %19, %21 : vector<128x128xf32>
    %cst_14 = arith.constant 0.000000e+00 : f32
    %23 = vector.broadcast %cst_14 : f32 to vector<128x128xf32>
    %24 = arith.maximumf %22, %23 : vector<128x128xf32>
    %25 = arith.truncf %24 : vector<128x128xf32> to vector<128x128xbf16>
    %cst_15 = arith.constant dense<0.000000e+00> : vector<128x128xf32>
    %26 = tpu.matmul %25, %3, %cst_15 {dimension_numbers = #tpu.dot_dimension_numbers<[1], [0], [0], [1], [0, 0, 1, 1], [], []>} : vector<128x128xbf16>, vector<128x128xbf16>, vector<128x128xf32> -> vector<128x128xf32>
    %c3 = arith.constant 3 : index
    %c0_16 = arith.constant 0 : index
    %27 = vector.load %arg3[%c3, %c0_16] : memref<8x128xf32, #tpu.memory_space<vmem>>, vector<1x128xf32>
    %28 = vector.broadcast %27 : vector<1x128xf32> to vector<128x128xf32>
    %29 = arith.addf %26, %28 : vector<128x128xf32>
    %30 = math.tanh %29 : vector<128x128xf32>
    %c0_17 = arith.constant 0 : index
    %c0_18 = arith.constant 0 : index
    %31 = vector.load %arg4[%c0_17, %c0_18] : memref<128x128xf32, #tpu.memory_space<vmem>>, vector<128x128xf32>
    tpu.vector_store %arg4[%c0_17, %c0_18], %30 {strides = array<i32>} : memref<128x128xf32, #tpu.memory_space<vmem>>, vector<128x128xf32>,
    return
  }
  func.func @transform_0(%arg0: i32) -> (i32, i32) {
    %c0_i32 = arith.constant 0 : i32
    %c0_i32_0 = arith.constant 0 : i32
    return %arg0, %c0_i32 : i32, i32
  }
  func.func @transform_1(%arg0: i32) -> (i32, i32) {
    %c0_i32 = arith.constant 0 : i32
    %c0_i32_0 = arith.constant 0 : i32
    %c0_i32_1 = arith.constant 0 : i32
    return %c0_i32, %c0_i32_0 : i32, i32
  }
  func.func @transform_2(%arg0: i32) -> (i32, i32) {
    %c0_i32 = arith.constant 0 : i32
    %c0_i32_0 = arith.constant 0 : i32
    %c0_i32_1 = arith.constant 0 : i32
    return %c0_i32, %c0_i32_0 : i32, i32
  }
  func.func @transform_3(%arg0: i32) -> (i32, i32) {
    %c0_i32 = arith.constant 0 : i32
    %c0_i32_0 = arith.constant 0 : i32
    return %arg0, %c0_i32 : i32, i32
  }
}

</mosaic_0001>

<bundles_post_ra>
// kernel: tpu_custom_call.1
= control target key start
LH: loop header
LB: loop body
LE: loop exit
PB: predicated region body
PF: predicated region fallthrough
CT: control target
= control target key end

     0   :  { %8 = vsyncpa [#allocation3], 0  ;;  %s1706_s0 = inlined_call_operand.hbm [shape: bf16[256,128], index: 0, kind: input, shape index: {}]   ;;  %s1707_s1 = inlined_call_operand.hbm [shape: bf16[512,128], index: 1, kind: input, shape index: {}]   ;;  %s1708_s2 = inlined_call_operand.hbm [shape: f32[8,128], index: 2, kind: input, shape index: {}]   ;;  %s1709_s3 = inlined_call_operand.hbm [shape: f32[256,128], index: 3, kind: output, shape index: {}]  }
   0x1   :  { %10 = vsyncpa [#allocation3 + $0x1], 0 }
   0x2   :  { %11 = vsyncpa [#allocation6], 0 }
   0x3   :  { %12 = vsyncpa [#allocation4], 0 }
   0x4   :  { %14 = vsyncpa [#allocation4 + $0x1], 0  ;;  %s1475_s12 = smov 0   ;;  %s1477_s13 = smov 0  }
   0x5   :  { %s1479_s14 = smov 0   ;;  %s1481_s15 = smov 0  }
   0x6 LB: > { %s1496_s16 = sadd.s32 4294967295, %s1447_s15   ;;  %s960_s17 = sadd.s32 4294967294, %s1447_s15   ;;  %s1447_s15 = sphi %s1481_s15, %s1719_s15   ;;  %s1443_s14 = sphi %s1479_s14, %s1718_s14   ;;  %s1439_s13 = sphi %s1477_s13, %s1717_s13   ;;  %s1435_s12 = sphi %s1475_s12, %s1716_s12  }
   0x7   : > { %p40_p0 = scmp.ne.s32.totalorder %s1439_s13, %s1435_s12  ;;  %p41_p1 = scmp.eq.s32.totalorder %s1496_s16, 0 }
   0x8   : > { %p106_p2 = scmp.eq.s32.totalorder %s1496_s16, 1  ;;  %p112_p3 = scmp.eq.s32.totalorder %s960_s17, 1 }
   0x9   : > { %p1505_p4 = por %p41_p1, %p40_p0  ;;  %p961_p5 = scmp.ge.s32.totalorder %s1447_s15, 1 }
   0xa   : > { %p1510_p6 = por %p112_p3, %p40_p0  ;;  %p119_p7 = scmp.lt.s32.totalorder %s1447_s15, 3 }
   0xb   : > { %s130_s22 = sshll.u32 %s1707_s1, 4  ;;  %s1449_s24 = smov [#allocation5]   ;;  %s131_s22 = int_to_ptr.hbm [resolvable:$true] %s130_s22 }
   0xc   : > { %p1518_p8 = pnand %p961_p5, %p119_p7  ;;  %s132_s25 = sshll.u32 %s1449_s24, 4  ;;  %s133_s25 = int_to_ptr.vmem [resolvable:$true] %s132_s25 }
   0xd   : > { %s145_s28 = sshll.u32 %s1708_s2, 4  ;;  %s1450_s29 = smov 64   ;;  %s146_s28 = int_to_ptr.hbm [resolvable:$true] %s145_s28 }
   0xe   : > { %p1192_p9 = pneg %p1518_p8  ;;  %s1451_s30 = smov 4  }
   0xf   : > { %s1452_s4 = smov [#allocation7]   ;;  %s1534_s6 = sadd.s32 1, %s1447_s15  }
  0x10   : > { %p1193_p10 = pnand %p1192_p9, %p41_p1  ;;  %s147_s5 = sshll.u32 %s1452_s4, 4  ;;  %s148_s5 = int_to_ptr.vmem [resolvable:$true] %s147_s5 }
  0x11   : > { %s27_s7 = sadd.s32 1, %s1443_s14  ;;  %s24_s8 = ssub.s32 %s1447_s15, %s1534_s6 }
  0x12   : > { %1195 = dma.hbm_to_vmem [thread:$0]  (!%p1193_p10), %s131_s22, 4096, %s133_s25, [#allocation6], %s1450_s29, %s1450_s29, %s1451_s30  }
  0x13   : > { %1198 = dma.hbm_to_vmem [thread:$0]  (!%p1193_p10), %s146_s28, 128, %s148_s5, [#allocation6]  }
  0x14   : > { %p34_p12 = scmp.ne.s32.totalorder %s1443_s14, %s1439_s13  ;;  %p25_p13 = scmp.eq.s32.totalorder %s24_s8, 0 }
  0x15   : > { %p35_p0 = scmp.eq.s32.totalorder %s1447_s15, 0  ;;  %p1209_p5 = scmp.lt.s32.totalorder %s1447_s15, 2 }
  0x16   : > { %p1544_p3 = por %p106_p2, %p34_p12  ;;  %s158_s11 = sand.u32 1, %s1443_s14  }
  0x17   : > { %s1550_s10 = scalar_select %p25_p13, %s1443_s14, %s27_s7  }
  0x18   : > { %p36_p7 = por %p35_p0, %p34_p12  ;;  %s965_s17 = sshll.u32 %s158_s11, 6 }
  0x19   : > { %s1138_s20 = sshll.u32 %s1447_s15, 6  ;;  %s162_s25 = scalar_lea.vmem [#allocation2], %s965_s17 }
  0x1a   : > { %s167_s24 = scalar_lea.hbm %s1706_s0, %s1138_s20  ;;  %s170_s26 = sshll.u32 %s162_s25, 4  ;;  %s171_s26 = int_to_ptr.vmem [resolvable:$true] %s170_s26 }
  0x1b   : > { %s168_s27 = sshll.u32 %s167_s24, 4  ;;  %p1557_p2 = pnand %p1209_p5, %p36_p7  ;;  %s169_s27 = int_to_ptr.hbm [resolvable:$true] %s168_s27 }
  0x1c   : > { %s159_s4 = scalar_lea.sflag [#allocation3], %s158_s11  ;;  %s1347_s5 = sshra.s32 %s169_s27, 4  ;;  %s1348_s5 = int_to_ptr.hbm [resolvable:$true] %s1347_s5 }
  0x1d   : > { %s1349_s7 = scalar_lea.hbm %s1348_s5, 64  ;;  %p1351_p10 = pneg %p1557_p2 }
  0x1e   : > { %p1350_p9 = scmp.ne.s32.totalorder %s1348_s5, %s1349_s7  ;;  %s1354_s20 = scalar_lea.hbm %s1706_s0, 128 }
  0x1f   : > { %p1355_p0 = scmp.lt.s32.totalorder %s1348_s5, %s1706_s0  ;;  %p1356_p5 = scmp.lt.s32.totalorder %s1354_s20, %s1349_s7 }
  0x20   : > { %p1352_p12 = pnand %p1351_p10, %p1350_p9 }
  0x21   : > { %p1357_p7 = por %p1356_p5, %p1355_p0 }
  0x22   : > { %p1353_p13 = pneg %p1352_p12 }
  0x24   : > { %p1358_p11 = pnand %p1357_p7, %p1353_p13 }
  0x26   : > { %1361 = shalt.err (!%p1358_p11)
}
  0x27   : > { %1202 = dma.hbm_to_vmem [thread:$0]  (!%p1557_p2), %s169_s27, 1024, %s171_s26, %s159_s4, %s1450_s29, %s1450_s29, %s1451_s30  }
  0x28   : > { %182 = sbr.rel (%p1518_p8) target bundleno = 771 (0x303), region = 32  ;;  %s1577_s11 = sand.u32 (!%p1518_p8), 1, %s1439_s13  }
  0x29   : > { %s969_s24 = sshll.u32 (!%p1518_p8), %s1577_s11, 6  ;;  %s185_s25 = scalar_lea.sflag (!%p1518_p8), [#allocation3], %s1577_s11 }
  0x2a   : > { %s1581_s5 = scalar_lea.vmem (!%p1518_p8), [#allocation2], %s969_s24 }
  0x2d   : > { %1422 = dma.done.wait (%p1505_p4), %s185_s25, 1024  }
  0x2e   : > { %1424 = vsyncadd (%p1505_p4), %s185_s25, 4294966272 }
  0x2f   : > { %1426 = dma.done.wait (%p41_p1), [#allocation6], 4224  }
  0x30   : > { %1428 = vsyncadd (%p41_p1), [#allocation6], 4294963072  ;;  %v1146_v0 = vld [vmem:[#allocation5 + $0x38] sm:$0xff]  ;;  %v1145_v1 = vld [vmem:[#allocation5 + $0x30] sm:$0xff]  ;;  %s972_s18 = sshll.u32 %s1577_s11, 7  ;;  %s1179_s29 = sshll.u32 %s1496_s16, 7 }
  0x31   : > { %402 = vmatpush.bf16.msra.mxu0 %v1146_v0  ;;  %v1144_v2 = vld [vmem:[#allocation5 + $0x28] sm:$0xff]  ;;  %v1143_v3 = vld [vmem:[#allocation5 + $0x20] sm:$0xff]  ;;  %v1142_v4 = vld [vmem:[#allocation5 + $0x18] sm:$0xff]  ;;  %s1640_s23 = scalar_lea.vmem [#allocation8], %s972_s18  ;;  %s864_s27 = scalar_lea.hbm %s1709_s3, %s1179_s29 }
  0x32   : > { %v1141_v5 = vld [vmem:[#allocation5 + $0x10] sm:$0xff]  ;;  %v1140_v6 = vld [vmem:[#allocation5 + $0x8] sm:$0xff]  ;;  %v1139_v7 = vld [vmem:[#allocation5] sm:$0xff]  ;;  %s865_s28 = sshll.u32 %s1640_s23, 4  ;;  %s867_s4 = sshll.u32 %s864_s27, 4  ;;  %s866_s28 = int_to_ptr.vmem [resolvable:$true] %s865_s28  ;;  %s868_s4 = int_to_ptr.hbm [resolvable:$true] %s867_s4 }
  0x33   : > { %v1171_v8 = vld [vmem:[%s1581_s5] sm:$0xff]  ;;  %v1172_v9 = vld [vmem:[%s1581_s5 + $0x8] sm:$0xff]  ;;  %v1173_v10 = vld [vmem:[%s1581_s5 + $0x10] sm:$0xff]  ;;  %s853_s7 = scalar_lea.sflag [#allocation4], %s1577_s11  ;;  %s1391_s8 = sshra.s32 %s868_s4, 4  ;;  %s1392_s8 = int_to_ptr.hbm [resolvable:$true] %s1391_s8 }
  0x34   : > { %v1174_v11 = vld [vmem:[%s1581_s5 + $0x18] sm:$0xff]  ;;  %v1175_v12 = vld [vmem:[%s1581_s5 + $0x20] sm:$0xff]  ;;  %v1176_v14 = vld [vmem:[%s1581_s5 + $0x28] sm:$0xff]  ;;  %s1393_s16 = scalar_lea.hbm %s1392_s8, 128  ;;  %s1397_s21 = scalar_lea.hbm %s1709_s3, 256 }
  0x35   : > { %403 = vmatpush.bf16.msra.mxu0 %v1145_v1  ;;  %v1154_v13 = vld [vmem:[#allocation5 + $0x78] sm:$0xff]  ;;  %v1153_v15 = vld [vmem:[#allocation5 + $0x70] sm:$0xff]  ;;  %v1152_v16 = vld [vmem:[#allocation5 + $0x68] sm:$0xff]  ;;  %p1394_p1 = scmp.ne.s32.totalorder %s1392_s8, %s1393_s16  ;;  %p1398_p11 = scmp.lt.s32.totalorder %s1392_s8, %s1709_s3 }
  0x36   : > { %525 = vmatpush.bf16.msra.mxu1 %v1154_v13  ;;  %v1151_v17 = vld [vmem:[#allocation5 + $0x60] sm:$0xff]  ;;  %v1150_v18 = vld [vmem:[#allocation5 + $0x58] sm:$0xff]  ;;  %v1177_v19 = vld [vmem:[%s1581_s5 + $0x30] sm:$0xff]  ;;  %p1399_p2 = scmp.lt.s32.totalorder %s1397_s21, %s1393_s16 }
  0x37   : > { %v1149_v20 = vld [vmem:[#allocation5 + $0x50] sm:$0xff]  ;;  %v1148_v21 = vld [vmem:[#allocation5 + $0x48] sm:$0xff]  ;;  %v1147_v22 = vld [vmem:[#allocation5 + $0x40] sm:$0xff]  ;;  %p1395_p4 = pnand %p1394_p1, %p1544_p3 }
  0x38   : > { %v1178_v23 = vld [vmem:[%s1581_s5 + $0x38] sm:$0xff]  ;;  %v1599_v25 = vld [vmem:[#allocation7] ss:$0 sm:$0xff]  ;;  %p1400_p9 = por %p1399_p2, %p1398_p11 }
  0x39   : > { %404 = vmatpush.bf16.msra.mxu0 %v1144_v2  ;;  %v1162_v0 = vld [vmem:[#allocation5 + $0xb8] sm:$0xff]  ;;  %p1396_p8 = pneg %p1395_p4 }
  0x3a   : > { %526 = vmatpush.bf16.msra.mxu1 %v1153_v15  ;;  %648 = vmatpush.bf16.msra.mxu2 %v1162_v0  ;;  %v1157_v15 = vld [vmem:[#allocation5 + $0x90] sm:$0xff] }
  0x3b   : > { %p1401_p10 = pnand %p1400_p9, %p1396_p8 }
  0x3d   : > { %405 = vmatpush.bf16.msra.mxu0 %v1143_v3 }
  0x3e   : > { %527 = vmatpush.bf16.msra.mxu1 %v1152_v16 }
  0x41   : > { %406 = vmatpush.bf16.msra.mxu0 %v1142_v4  ;;  %v1161_v4 = vld [vmem:[#allocation5 + $0xb0] sm:$0xff] }
  0x42   : > { %528 = vmatpush.bf16.msra.mxu1 %v1151_v17  ;;  %649 = vmatpush.bf16.msra.mxu2 %v1161_v4  ;;  %v1156_v17 = vld [vmem:[#allocation5 + $0x88] sm:$0xff]  ;;  %v1170_v4 = vld [vmem:[#allocation5 + $0xf8] sm:$0xff] }
  0x43   : > { %771 = vmatpush.bf16.msra.mxu3 %v1170_v4 }
  0x45   : > { %407 = vmatpush.bf16.msra.mxu0 %v1141_v5 }
  0x46   : > { %529 = vmatpush.bf16.msra.mxu1 %v1150_v18  ;;  %v1155_v18 = vld [vmem:[#allocation5 + $0x80] sm:$0xff] }
  0x49   : > { %408 = vmatpush.bf16.msra.mxu0 %v1140_v6  ;;  %v1160_v6 = vld [vmem:[#allocation5 + $0xa8] sm:$0xff] }
  0x4a   : > { %530 = vmatpush.bf16.msra.mxu1 %v1149_v20  ;;  %650 = vmatpush.bf16.msra.mxu2 %v1160_v6  ;;  %v1169_v6 = vld [vmem:[#allocation5 + $0xf0] sm:$0xff] }
  0x4b   : > { %772 = vmatpush.bf16.msra.mxu3 %v1169_v6 }
  0x4d   : > { %409 = vmatpush.bf16.msra.mxu0 %v1139_v7  ;;  %v1159_v7 = vld [vmem:[#allocation5 + $0xa0] sm:$0xff] }
  0x4e   : > { %531 = vmatpush.bf16.msra.mxu1 %v1148_v21  ;;  %651 = vmatpush.bf16.msra.mxu2 %v1159_v7  ;;  %v1168_v7 = vld [vmem:[#allocation5 + $0xe8] sm:$0xff] }
  0x4f   : > { %773 = vmatpush.bf16.msra.mxu3 %v1168_v7 }
  0x50   : > { %410 = vmatmul.bf16.vlgmr.msra.gmra.mxu0 %v1171_v8 }
  0x52   : > { %532 = vmatpush.bf16.msra.mxu1 %v1147_v22 }
  0x60   : > { %415 = vmatmul.bf16.gmra.mxu0 %v1172_v9 }
  0x70   : > { %420 = vmatmul.bf16.gmra.mxu0 %v1173_v10 }
  0x80   : > { %425 = vmatmul.bf16.gmra.mxu0 %v1174_v11  ;;  %v1158_v11 = vld [vmem:[#allocation5 + $0x98] sm:$0xff] }
  0x81   : > { %652 = vmatpush.bf16.msra.mxu2 %v1158_v11  ;;  %v1167_v11 = vld [vmem:[#allocation5 + $0xe0] sm:$0xff] }
  0x82   : > { %774 = vmatpush.bf16.msra.mxu3 %v1167_v11 }
  0x85   : > { %653 = vmatpush.bf16.msra.mxu2 %v1157_v15 }
  0x89   : > { %654 = vmatpush.bf16.msra.mxu2 %v1156_v17  ;;  %v1165_v17 = vld [vmem:[#allocation5 + $0xd0] sm:$0xff] }
  0x8d   : > { %655 = vmatpush.bf16.msra.mxu2 %v1155_v18 }
  0x90   : > { %430 = vmatmul.bf16.gmra.mxu0 %v1175_v12 }
  0xa0   : > { %435 = vmatmul.bf16.gmra.mxu0 %v1176_v14 }
  0xb0   : > { %440 = vmatmul.bf16.gmra.mxu0 %v1177_v19 }
  0xc0   : > { %445 = vmatmul.bf16.gmra.mxu0 %v1178_v23 }
  0xcd   : > { %v411_v24 = vpop.f32.mrf.mxu0 }
  0xce   : > { %v412_v26 = vadd.f32 %v1599_v25, %v411_v24 }
  0xd0   : > { %v451_v29 = vmax.f32 %v412_v26, 0.0 }
  0xd5   : > { %v413_v27 = vpop.f32.mrf.mxu0 }
  0xd6   : > { %v414_v28 = vadd.f32 %v1599_v25, %v413_v27  ;;  %v1617_v27 = vld [vmem:[#allocation7 + $0x1] ss:$0 sm:$0xff] }
  0xd8   : > { %v452_v30 = vmax.f32 %v414_v28, 0.0 }
  0xda   : > { %v467_v31 = vpack.c.bf16 %v452_v30, %v451_v29 }
  0xdc   : > { %533 = vmatmul.bf16.vlgmr.msra.gmra.mxu1 %v467_v31 }
  0xdd   : > { %v416_v32 = vpop.f32.mrf.mxu0 }
  0xde   : > { %v417_v33 = vadd.f32 %v1599_v25, %v416_v32 }
  0xe0   : > { %v453_v36 = vmax.f32 %v417_v33, 0.0 }
  0xe5   : > { %v418_v34 = vpop.f32.mrf.mxu0 }
  0xe6   : > { %v419_v35 = vadd.f32 %v1599_v25, %v418_v34 }
  0xe8   : > { %v454_v37 = vmax.f32 %v419_v35, 0.0 }
  0xea   : > { %v468_v38 = vpack.c.bf16 %v454_v37, %v453_v36 }
  0xec   : > { %538 = vmatmul.bf16.gmra.mxu1 %v468_v38 }
  0xed   : > { %v421_v39 = vpop.f32.mrf.mxu0 }
  0xee   : > { %v422_v40 = vadd.f32 %v1599_v25, %v421_v39 }
  0xf0   : > { %v455_v43 = vmax.f32 %v422_v40, 0.0 }
  0xf5   : > { %v423_v41 = vpop.f32.mrf.mxu0 }
  0xf6   : > { %v424_v42 = vadd.f32 %v1599_v25, %v423_v41 }
  0xf8   : > { %v456_v44 = vmax.f32 %v424_v42, 0.0 }
  0xfa   : > { %v469_v45 = vpack.c.bf16 %v456_v44, %v455_v43 }
  0xfc   : > { %543 = vmatmul.bf16.gmra.mxu1 %v469_v45 }
  0xfd   : > { %v426_v46 = vpop.f32.mrf.mxu0 }
  0xfe   : > { %v427_v47 = vadd.f32 %v1599_v25, %v426_v46 }
 0x100   : > { %v457_v50 = vmax.f32 %v427_v47, 0.0 }
 0x105   : > { %v428_v48 = vpop.f32.mrf.mxu0 }
 0x106   : > { %v429_v49 = vadd.f32 %v1599_v25, %v428_v48 }
 0x108   : > { %v458_v51 = vmax.f32 %v429_v49, 0.0 }
 0x10a   : > { %v470_v52 = vpack.c.bf16 %v458_v51, %v457_v50 }
 0x10c   : > { %548 = vmatmul.bf16.gmra.mxu1 %v470_v52 }
 0x10d   : > { %v431_v53 = vpop.f32.mrf.mxu0 }
 0x10e   : > { %v432_v54 = vadd.f32 %v1599_v25, %v431_v53 }
 0x110   : > { %v459_v57 = vmax.f32 %v432_v54, 0.0 }
 0x115   : > { %v433_v55 = vpop.f32.mrf.mxu0 }
 0x116   : > { %v434_v56 = vadd.f32 %v1599_v25, %v433_v55 }
 0x118   : > { %v460_v58 = vmax.f32 %v434_v56, 0.0 }
 0x11a   : > { %v471_v59 = vpack.c.bf16 %v460_v58, %v459_v57 }
 0x11c   : > { %553 = vmatmul.bf16.gmra.mxu1 %v471_v59 }
 0x11d   : > { %v436_v60 = vpop.f32.mrf.mxu0 }
 0x11e   : > { %v437_v61 = vadd.f32 %v1599_v25, %v436_v60 }
 0x120   : > { %v461_v1 = vmax.f32 %v437_v61, 0.0 }
 0x125   : > { %v438_v62 = vpop.f32.mrf.mxu0 }
 0x126   : > { %v439_v63 = vadd.f32 %v1599_v25, %v438_v62 }
 0x128   : > { %v462_v2 = vmax.f32 %v439_v63, 0.0 }
 0x12a   : > { %v472_v3 = vpack.c.bf16 %v462_v2, %v461_v1 }
 0x12c   : > { %558 = vmatmul.bf16.gmra.mxu1 %v472_v3 }
 0x12d   : > { %v441_v5 = vpop.f32.mrf.mxu0 }
 0x12e   : > { %v442_v8 = vadd.f32 %v1599_v25, %v441_v5 }
 0x130   : > { %v463_v12 = vmax.f32 %v442_v8, 0.0 }
 0x135   : > { %v443_v9 = vpop.f32.mrf.mxu0 }
 0x136   : > { %v444_v10 = vadd.f32 %v1599_v25, %v443_v9 }
 0x138   : > { %v464_v13 = vmax.f32 %v444_v10, 0.0 }
 0x13a   : > { %v473_v14 = vpack.c.bf16 %v464_v13, %v463_v12 }
 0x13c   : > { %563 = vmatmul.bf16.gmra.mxu1 %v473_v14 }
 0x13d   : > { %v446_v16 = vpop.f32.mrf.mxu0 }
 0x13e   : > { %v447_v19 = vadd.f32 %v1599_v25, %v446_v16  ;;  %v1166_v16 = vld [vmem:[#allocation5 + $0xd8] sm:$0xff] }
 0x13f   : > { %775 = vmatpush.bf16.msra.mxu3 %v1166_v16 }
 0x140   : > { %v465_v22 = vmax.f32 %v447_v19, 0.0 }
 0x143   : > { %776 = vmatpush.bf16.msra.mxu3 %v1165_v17 }
 0x145   : > { %v448_v20 = vpop.f32.mrf.mxu0 }
 0x146   : > { %v449_v21 = vadd.f32 %v1599_v25, %v448_v20  ;;  %v1164_v20 = vld [vmem:[#allocation5 + $0xc8] sm:$0xff] }
 0x147   : > { %777 = vmatpush.bf16.msra.mxu3 %v1164_v20 }
 0x148   : > { %v466_v23 = vmax.f32 %v449_v21, 0.0 }
 0x14a   : > { %v474_v24 = vpack.c.bf16 %v466_v23, %v465_v22 }
 0x14c   : > { %568 = vmatmul.bf16.gmra.mxu1 %v474_v24  ;;  %v1163_v24 = vld [vmem:[#allocation5 + $0xc0] sm:$0xff] }
 0x14d   : > { %778 = vmatpush.bf16.msra.mxu3 %v1163_v24 }
 0x159   : > { %v534_v26 = vpop.f32.mrf.mxu1 }
 0x15a   : > { %v535_v28 = vadd.f32 %v1617_v27, %v534_v26 }
 0x15c   : > { %v574_v31 = vmax.f32 %v535_v28, 0.0 }
 0x161   : > { %v536_v29 = vpop.f32.mrf.mxu1 }
 0x162   : > { %v537_v30 = vadd.f32 %v1617_v27, %v536_v29  ;;  %v1253_v29 = vld [vmem:[#allocation7 + $0x2] ss:$0 sm:$0xff] }
 0x164   : > { %v575_v32 = vmax.f32 %v537_v30, 0.0 }
 0x166   : > { %v590_v33 = vpack.c.bf16 %v575_v32, %v574_v31 }
 0x168   : > { %656 = vmatmul.bf16.vlgmr.msra.gmra.mxu2 %v590_v33 }
 0x169   : > { %v539_v34 = vpop.f32.mrf.mxu1 }
 0x16a   : > { %v540_v35 = vadd.f32 %v1617_v27, %v539_v34 }
 0x16c   : > { %v576_v37 = vmax.f32 %v540_v35, 0.0 }
 0x171   : > { %v541_v25 = vpop.f32.mrf.mxu1 }
 0x172   : > { %v542_v36 = vadd.f32 %v1617_v27, %v541_v25 }
 0x174   : > { %v577_v38 = vmax.f32 %v542_v36, 0.0 }
 0x176   : > { %v591_v39 = vpack.c.bf16 %v577_v38, %v576_v37 }
 0x178   : > { %661 = vmatmul.bf16.gmra.mxu2 %v591_v39 }
 0x179   : > { %v544_v40 = vpop.f32.mrf.mxu1 }
 0x17a   : > { %v545_v41 = vadd.f32 %v1617_v27, %v544_v40 }
 0x17c   : > { %v578_v44 = vmax.f32 %v545_v41, 0.0 }
 0x181   : > { %v546_v42 = vpop.f32.mrf.mxu1 }
 0x182   : > { %v547_v43 = vadd.f32 %v1617_v27, %v546_v42 }
 0x184   : > { %v579_v45 = vmax.f32 %v547_v43, 0.0 }
 0x186   : > { %v592_v46 = vpack.c.bf16 %v579_v45, %v578_v44 }
 0x188   : > { %666 = vmatmul.bf16.gmra.mxu2 %v592_v46 }
 0x189   : > { %v549_v47 = vpop.f32.mrf.mxu1 }
 0x18a   : > { %v550_v48 = vadd.f32 %v1617_v27, %v549_v47 }
 0x18c   : > { %v580_v51 = vmax.f32 %v550_v48, 0.0 }
 0x191   : > { %v551_v49 = vpop.f32.mrf.mxu1 }
 0x192   : > { %v552_v50 = vadd.f32 %v1617_v27, %v551_v49 }
 0x194   : > { %v581_v52 = vmax.f32 %v552_v50, 0.0 }
 0x196   : > { %v593_v53 = vpack.c.bf16 %v581_v52, %v580_v51 }
 0x198   : > { %671 = vmatmul.bf16.gmra.mxu2 %v593_v53 }
 0x199   : > { %v554_v54 = vpop.f32.mrf.mxu1 }
 0x19a   : > { %v555_v55 = vadd.f32 %v1617_v27, %v554_v54 }
 0x19c   : > { %v582_v58 = vmax.f32 %v555_v55, 0.0 }
 0x1a1   : > { %v556_v56 = vpop.f32.mrf.mxu1 }
 0x1a2   : > { %v557_v57 = vadd.f32 %v1617_v27, %v556_v56 }
 0x1a4   : > { %v583_v59 = vmax.f32 %v557_v57, 0.0 }
 0x1a6   : > { %v594_v60 = vpack.c.bf16 %v583_v59, %v582_v58 }
 0x1a8   : > { %676 = vmatmul.bf16.gmra.mxu2 %v594_v60 }
 0x1a9   : > { %v559_v61 = vpop.f32.mrf.mxu1 }
 0x1aa   : > { %v560_v62 = vadd.f32 %v1617_v27, %v559_v61 }
 0x1ac   : > { %v584_v1 = vmax.f32 %v560_v62, 0.0 }
 0x1b1   : > { %v561_v63 = vpop.f32.mrf.mxu1 }
 0x1b2   : > { %v562_v0 = vadd.f32 %v1617_v27, %v561_v63 }
 0x1b4   : > { %v585_v2 = vmax.f32 %v562_v0, 0.0 }
 0x1b6   : > { %v595_v3 = vpack.c.bf16 %v585_v2, %v584_v1 }
 0x1b8   : > { %681 = vmatmul.bf16.gmra.mxu2 %v595_v3 }
 0x1b9   : > { %v564_v5 = vpop.f32.mrf.mxu1 }
 0x1ba   : > { %v565_v8 = vadd.f32 %v1617_v27, %v564_v5 }
 0x1bc   : > { %v586_v12 = vmax.f32 %v565_v8, 0.0 }
 0x1c1   : > { %v566_v9 = vpop.f32.mrf.mxu1 }
 0x1c2   : > { %v567_v10 = vadd.f32 %v1617_v27, %v566_v9 }
 0x1c4   : > { %v587_v13 = vmax.f32 %v567_v10, 0.0 }
 0x1c6   : > { %v596_v14 = vpack.c.bf16 %v587_v13, %v586_v12 }
 0x1c8   : > { %686 = vmatmul.bf16.gmra.mxu2 %v596_v14 }
 0x1c9   : > { %v569_v15 = vpop.f32.mrf.mxu1 }
 0x1ca   : > { %v570_v18 = vadd.f32 %v1617_v27, %v569_v15 }
 0x1cc   : > { %v588_v22 = vmax.f32 %v570_v18, 0.0 }
 0x1d1   : > { %v571_v19 = vpop.f32.mrf.mxu1 }
 0x1d2   : > { %v572_v21 = vadd.f32 %v1617_v27, %v571_v19  ;;  %v1635_v19 = vld [vmem:[#allocation7 + $0x3] ss:$0 sm:$0xff] }
 0x1d4   : > { %v589_v23 = vmax.f32 %v572_v21, 0.0 }
 0x1d6   : > { %v597_v26 = vpack.c.bf16 %v589_v23, %v588_v22 }
 0x1d8   : > { %691 = vmatmul.bf16.gmra.mxu2 %v597_v26 }
 0x1eb   : > { %v657_v28 = vpop.f32.mrf.mxu2 }
 0x1ec   : > { %v658_v30 = vadd.f32 %v1253_v29, %v657_v28 }
 0x1ee   : > { %v697_v33 = vmax.f32 %v658_v30, 0.0 }
 0x1f3   : > { %v659_v31 = vpop.f32.mrf.mxu2 }
 0x1f4   : > { %v660_v32 = vadd.f32 %v1253_v29, %v659_v31 }
 0x1f6   : > { %v698_v34 = vmax.f32 %v660_v32, 0.0 }
 0x1f8   : > { %v713_v35 = vpack.c.bf16 %v698_v34, %v697_v33 }
 0x1fa   : > { %779 = vmatmul.bf16.vlgmr.msra.gmra.mxu3 %v713_v35 }
 0x1fb   : > { %v662_v25 = vpop.f32.mrf.mxu2 }
 0x1fc   : > { %v663_v36 = vadd.f32 %v1253_v29, %v662_v25 }
 0x1fe   : > { %v699_v38 = vmax.f32 %v663_v36, 0.0 }
 0x203   : > { %v664_v37 = vpop.f32.mrf.mxu2 }
 0x204   : > { %v665_v27 = vadd.f32 %v1253_v29, %v664_v37 }
 0x206   : > { %v700_v39 = vmax.f32 %v665_v27, 0.0 }
 0x208   : > { %v714_v40 = vpack.c.bf16 %v700_v39, %v699_v38 }
 0x20a   : > { %784 = vmatmul.bf16.gmra.mxu3 %v714_v40 }
 0x20b   : > { %v667_v41 = vpop.f32.mrf.mxu2 }
 0x20c   : > { %v668_v42 = vadd.f32 %v1253_v29, %v667_v41 }
 0x20e   : > { %v701_v45 = vmax.f32 %v668_v42, 0.0 }
 0x213   : > { %v669_v43 = vpop.f32.mrf.mxu2 }
 0x214   : > { %v670_v44 = vadd.f32 %v1253_v29, %v669_v43 }
 0x216   : > { %v702_v46 = vmax.f32 %v670_v44, 0.0 }
 0x218   : > { %v715_v47 = vpack.c.bf16 %v702_v46, %v701_v45 }
 0x21a   : > { %789 = vmatmul.bf16.gmra.mxu3 %v715_v47 }
 0x21b   : > { %v672_v48 = vpop.f32.mrf.mxu2 }
 0x21c   : > { %v673_v49 = vadd.f32 %v1253_v29, %v672_v48 }
 0x21e   : > { %v703_v52 = vmax.f32 %v673_v49, 0.0 }
 0x223   : > { %v674_v50 = vpop.f32.mrf.mxu2 }
 0x224   : > { %v675_v51 = vadd.f32 %v1253_v29, %v674_v50 }
 0x226   : > { %v704_v53 = vmax.f32 %v675_v51, 0.0 }
 0x228   : > { %v716_v54 = vpack.c.bf16 %v704_v53, %v703_v52 }
 0x22a   : > { %794 = vmatmul.bf16.gmra.mxu3 %v716_v54 }
 0x22b   : > { %v677_v55 = vpop.f32.mrf.mxu2 }
 0x22c   : > { %v678_v56 = vadd.f32 %v1253_v29, %v677_v55 }
 0x22e   : > { %v705_v59 = vmax.f32 %v678_v56, 0.0 }
 0x233   : > { %v679_v57 = vpop.f32.mrf.mxu2 }
 0x234   : > { %v680_v58 = vadd.f32 %v1253_v29, %v679_v57 }
 0x236   : > { %v706_v60 = vmax.f32 %v680_v58, 0.0 }
 0x238   : > { %v717_v61 = vpack.c.bf16 %v706_v60, %v705_v59 }
 0x23a   : > { %799 = vmatmul.bf16.gmra.mxu3 %v717_v61 }
 0x23b   : > { %v682_v62 = vpop.f32.mrf.mxu2 }
 0x23c   : > { %v683_v63 = vadd.f32 %v1253_v29, %v682_v62 }
 0x23e   : > { %v707_v2 = vmax.f32 %v683_v63, 0.0 }
 0x243   : > { %v684_v0 = vpop.f32.mrf.mxu2 }
 0x244   : > { %v685_v1 = vadd.f32 %v1253_v29, %v684_v0 }
 0x246   : > { %v708_v3 = vmax.f32 %v685_v1, 0.0 }
 0x248   : > { %v718_v4 = vpack.c.bf16 %v708_v3, %v707_v2 }
 0x24a   : > { %804 = vmatmul.bf16.gmra.mxu3 %v718_v4 }
 0x24b   : > { %v687_v5 = vpop.f32.mrf.mxu2 }
 0x24c   : > { %v688_v6 = vadd.f32 %v1253_v29, %v687_v5 }
 0x24e   : > { %v709_v9 = vmax.f32 %v688_v6, 0.0 }
 0x253   : > { %v689_v7 = vpop.f32.mrf.mxu2 }
 0x254   : > { %v690_v8 = vadd.f32 %v1253_v29, %v689_v7 }
 0x256   : > { %v710_v10 = vmax.f32 %v690_v8, 0.0 }
 0x258   : > { %v719_v11 = vpack.c.bf16 %v710_v10, %v709_v9 }
 0x25a   : > { %809 = vmatmul.bf16.gmra.mxu3 %v719_v11 }
 0x25b   : > { %v692_v12 = vpop.f32.mrf.mxu2 }
 0x25c   : > { %v693_v13 = vadd.f32 %v1253_v29, %v692_v12 }
 0x25e   : > { %v711_v16 = vmax.f32 %v693_v13, 0.0 }
 0x263   : > { %v694_v14 = vpop.f32.mrf.mxu2 }
 0x264   : > { %v695_v15 = vadd.f32 %v1253_v29, %v694_v14 }
 0x266   : > { %v712_v17 = vmax.f32 %v695_v15, 0.0 }
 0x268   : > { %v720_v18 = vpack.c.bf16 %v712_v17, %v711_v16 }
 0x26a   : > { %814 = vmatmul.bf16.gmra.mxu3 %v720_v18 }
 0x27d   : > { %v780_v20 = vpop.f32.mrf.mxu3 }
 0x27e   : > { %v781_v21 = vadd.f32 %v1635_v19, %v780_v20 }
 0x280   : > { %1255 = vtanh.f32 %v781_v21 }
 0x285   : > { %v782_v22 = vpop.f32.mrf.mxu3 }
 0x286   : > { %v1256_v23 = vpop.eup %1255  ;;  %v783_v24 = vadd.f32 %v1635_v19, %v782_v22 }
 0x287   : > { %836 = vst [vmem:[%s1640_s23] sm:$0xff] %v1256_v23 }
 0x288   : > { %1257 = vtanh.f32 %v783_v24 }
 0x28d   : > { %v785_v26 = vpop.f32.mrf.mxu3 }
 0x28e   : > { %v1258_v28 = vpop.eup %1257  ;;  %v786_v29 = vadd.f32 %v1635_v19, %v785_v26 }
 0x28f   : > { %837 = vst [vmem:[%s1640_s23 + $0x8] sm:$0xff] %v1258_v28 }
 0x290   : > { %1259 = vtanh.f32 %v786_v29 }
 0x295   : > { %v787_v30 = vpop.f32.mrf.mxu3 }
 0x296   : > { %v1260_v31 = vpop.eup %1259  ;;  %v788_v32 = vadd.f32 %v1635_v19, %v787_v30 }
 0x297   : > { %838 = vst [vmem:[%s1640_s23 + $0x10] sm:$0xff] %v1260_v31 }
 0x298   : > { %1261 = vtanh.f32 %v788_v32 }
 0x29d   : > { %v790_v33 = vpop.f32.mrf.mxu3 }
 0x29e   : > { %v1262_v34 = vpop.eup %1261  ;;  %v791_v35 = vadd.f32 %v1635_v19, %v790_v33 }
 0x29f   : > { %839 = vst [vmem:[%s1640_s23 + $0x18] sm:$0xff] %v1262_v34 }
 0x2a0   : > { %1263 = vtanh.f32 %v791_v35 }
 0x2a5   : > { %v792_v25 = vpop.f32.mrf.mxu3 }
 0x2a6   : > { %v1264_v36 = vpop.eup %1263  ;;  %v793_v37 = vadd.f32 %v1635_v19, %v792_v25 }
 0x2a7   : > { %840 = vst [vmem:[%s1640_s23 + $0x20] sm:$0xff] %v1264_v36 }
 0x2a8   : > { %1265 = vtanh.f32 %v793_v37 }
 0x2ad   : > { %v795_v27 = vpop.f32.mrf.mxu3 }
 0x2ae   : > { %v1266_v38 = vpop.eup %1265  ;;  %v796_v39 = vadd.f32 %v1635_v19, %v795_v27 }
 0x2af   : > { %841 = vst [vmem:[%s1640_s23 + $0x28] sm:$0xff] %v1266_v38 }
 0x2b0   : > { %1267 = vtanh.f32 %v796_v39 }
 0x2b5   : > { %v797_v40 = vpop.f32.mrf.mxu3 }
 0x2b6   : > { %v1268_v41 = vpop.eup %1267  ;;  %v798_v42 = vadd.f32 %v1635_v19, %v797_v40 }
 0x2b7   : > { %842 = vst [vmem:[%s1640_s23 + $0x30] sm:$0xff] %v1268_v41 }
 0x2b8   : > { %1269 = vtanh.f32 %v798_v42 }
 0x2bd   : > { %v800_v43 = vpop.f32.mrf.mxu3 }
 0x2be   : > { %v1270_v44 = vpop.eup %1269  ;;  %v801_v45 = vadd.f32 %v1635_v19, %v800_v43 }
 0x2bf   : > { %843 = vst [vmem:[%s1640_s23 + $0x38] sm:$0xff] %v1270_v44 }
 0x2c0   : > { %1271 = vtanh.f32 %v801_v45 }
 0x2c5   : > { %v802_v46 = vpop.f32.mrf.mxu3 }
 0x2c6   : > { %v1272_v47 = vpop.eup %1271  ;;  %v803_v48 = vadd.f32 %v1635_v19, %v802_v46 }
 0x2c7   : > { %844 = vst [vmem:[%s1640_s23 + $0x40] sm:$0xff] %v1272_v47 }
 0x2c8   : > { %1273 = vtanh.f32 %v803_v48 }
 0x2cd   : > { %v805_v49 = vpop.f32.mrf.mxu3 }
 0x2ce   : > { %v1274_v50 = vpop.eup %1273  ;;  %v806_v51 = vadd.f32 %v1635_v19, %v805_v49 }
 0x2cf   : > { %845 = vst [vmem:[%s1640_s23 + $0x48] sm:$0xff] %v1274_v50 }
 0x2d0   : > { %1275 = vtanh.f32 %v806_v51 }
 0x2d5   : > { %v807_v52 = vpop.f32.mrf.mxu3 }
 0x2d6   : > { %v1276_v53 = vpop.eup %1275  ;;  %v808_v54 = vadd.f32 %v1635_v19, %v807_v52 }
 0x2d7   : > { %846 = vst [vmem:[%s1640_s23 + $0x50] sm:$0xff] %v1276_v53 }
 0x2d8   : > { %1277 = vtanh.f32 %v808_v54 }
 0x2dd   : > { %v810_v55 = vpop.f32.mrf.mxu3 }
 0x2de   : > { %v1278_v56 = vpop.eup %1277  ;;  %v811_v57 = vadd.f32 %v1635_v19, %v810_v55 }
 0x2df   : > { %847 = vst [vmem:[%s1640_s23 + $0x58] sm:$0xff] %v1278_v56 }
 0x2e0   : > { %1279 = vtanh.f32 %v811_v57 }
 0x2e5   : > { %v812_v58 = vpop.f32.mrf.mxu3 }
 0x2e6   : > { %v1280_v59 = vpop.eup %1279  ;;  %v813_v60 = vadd.f32 %v1635_v19, %v812_v58 }
 0x2e7   : > { %848 = vst [vmem:[%s1640_s23 + $0x60] sm:$0xff] %v1280_v59 }
 0x2e8   : > { %1281 = vtanh.f32 %v813_v60 }
 0x2ed   : > { %v815_v61 = vpop.f32.mrf.mxu3 }
 0x2ee   : > { %v1282_v62 = vpop.eup %1281  ;;  %v816_v63 = vadd.f32 %v1635_v19, %v815_v61 }
 0x2ef   : > { %849 = vst [vmem:[%s1640_s23 + $0x68] sm:$0xff] %v1282_v62 }
 0x2f0   : > { %1283 = vtanh.f32 %v816_v63 }
 0x2f5   : > { %v817_v0 = vpop.f32.mrf.mxu3 }
 0x2f6   : > { %v1284_v1 = vpop.eup %1283  ;;  %v818_v2 = vadd.f32 %v1635_v19, %v817_v0 }
 0x2f7   : > { %850 = vst [vmem:[%s1640_s23 + $0x70] sm:$0xff] %v1284_v1 }
 0x2f8   : > { %1285 = vtanh.f32 %v818_v2 }
 0x2fe   : > { %v1286_v3 = vpop.eup %1285 }
 0x2ff   : > { %851 = vst [vmem:[%s1640_s23 + $0x78] sm:$0xff] %v1286_v3 }
 0x300   : > { %1404 = shalt.err (!%p1401_p10)
}
 0x301   : > { %s1453_s11 = smov 128   ;;  %s1454_s25 = smov 8  }
 0x302   : > { %1190 = dma.vmem_to_hbm [thread:$0]  (%p1544_p3), %s866_s28, 2048, %s868_s4, %s853_s7, %s1453_s11, %s1453_s11, %s1454_s25  }
 0x303 PF: > { %s882_s5 = sand.u32 1, %s1435_s12   ;;  %p1715_p12 = scmp.ge.s32.totalorder %s1447_s15, 2 }
 0x304   : > { %s883_s18 = scalar_lea.sflag [#allocation4], %s882_s5 }
 0x305   : > { %p1204_p13 = pnand %p1715_p12, %p1510_p6 }
 0x307   : > { %p1205_p0 = pneg %p1204_p13 }
 0x309   : > { %1430 = dma.done.wait (%p1205_p0), %s883_s18, 2048  }
 0x30a   : > { %1432 = vsyncadd (%p1205_p0), %s883_s18, 4294965248  ;;  %p17_p5 = scmp.ge.s32.totalorder %s1534_s6, 4   ;;  %s1716_s12 = smov %s1439_s13 }
 0x30b   : > { %s1717_s13 = smov %s1443_s14  ;;  %s1718_s14 = smov %s1550_s10 }
 0x30c   : > { %s1719_s15 = smov %s1534_s6  ;;  %19 = sbr.rel (!%p17_p5) target bundleno = 6 (0x6), region = 85 }
 0x311   :  { %889 = vsyncpa [#allocation3], 1 }
 0x312   :  { %891 = vsyncpa [#allocation3 + $0x1], 1 }
 0x313   :  { %892 = vsyncpa [#allocation6], 1 }
 0x314   :  { %893 = vsyncpa [#allocation4], 1 }
 0x315   :  { %895 = vsyncpa [#allocation4 + $0x1], 1 }

</bundles_post_ra>
